<compile_context>
chip_gen: v7x
topology: tpu7x:2x2x1
jax: 0.10.0
libtpu: 0.0.40
codegen_flags: <defaults>
</compile_context>

<pallas_src>
import math
import jax
import jax.numpy as jnp
from jax.experimental import pallas as pl
from jax.experimental.pallas import tpu as pltpu

_LN_EPS = 1e-5
_INV_SQRT2 = 1.0 / math.sqrt(2.0)
_GELU_C0 = 0.7978845608028654   # sqrt(2/pi)
_GELU_C1 = 0.044715


# --------------------------------------------------------------------------- #
# Kernel
# --------------------------------------------------------------------------- #
def _make_kernel(resident_w: bool, bf16_act: bool):
    """Kernel factory: weight access mode and activation dtype are compile-time."""
    act_dtype = jnp.bfloat16 if bf16_act else jnp.float32

    def kernel(x_ref, w_ref, p_ref, o_ref):
        d = pl.program_id(1)

        # First layer of this row-tile: seed the residual stream from the input.
        @pl.when(d == 0)
        def _():
            o_ref[...] = x_ref[...]

        x = o_ref[...]                                  # (TM, C) f32 residual

        # Weights: resident (depth, C, C) sliced by layer, or streamed (C, C).
        w = w_ref[d] if resident_w else w_ref[...]      # (C, C) bf16 = (W*mask)^T

        params = p_ref[...]                             # (3, C) f32
        bias = params[0:1, :]                           # (1, C) f32
        gamma = params[1:2, :].astype(act_dtype)
        beta = params[2:3, :].astype(act_dtype)

        # ---- LayerNorm statistics in f32 -----------------------------------
        mean = jnp.mean(x, axis=-1, keepdims=True)
        ctr = x - mean
        var = jnp.mean(ctr * ctr, axis=-1, keepdims=True)
        xn = (ctr * jax.lax.rsqrt(var + _LN_EPS)).astype(act_dtype)
        xn = xn * gamma + beta

        # ---- tanh-approx GELU (EUP tanh; |err| vs exact erf-GELU ~1e-3) ----
        h = 0.5 * xn * (1.0 + jnp.tanh(_GELU_C0 * (xn + _GELU_C1 * xn * xn * xn)))

        # TODO(synk): nn.Dropout(p) is identity in eval mode; training-mode
        # dropout (random mask + 1/(1-p) scaling) intentionally not implemented.

        # ---- masked linear: mask & transpose already folded into w ---------
        xx = jnp.dot(h.astype(jnp.bfloat16), w,
                     preferred_element_type=jnp.float32) + bias

        # ---- residual, accumulated in the resident f32 output block --------
        o_ref[...] = x + xx

    return kernel


# --------------------------------------------------------------------------- #
# Device / tiling heuristics
# --------------------------------------------------------------------------- #
def _device_kind() -> str:
    try:
        return jax.devices()[0].device_kind.lower()
    except Exception:
        return ""


def _vmem_capacity_bytes() -> int:
    try:
        return int(pltpu.get_tpu_info().vmem_capacity_bytes)
    except Exception:
        # v7x: 64 MiB per TensorCore; v5e/v6e: 128 MiB.
        return (64 if "v7" in _device_kind() else 128) * 1024 * 1024


def _choose_tiling(M: int, C: int, depth: int, vmem_cap: int):
    """Returns (TM, M_pad, resident_weights, weight_buffers, vmem_limit_bytes)."""
    budget = (vmem_cap * 3) // 4                      # headroom for compiler scratch
    w_all = depth * C * C * 2                         # bf16 weight stack
    p_all = depth * 3 * C * 4

    # Per-row VMEM cost: x tile (2x f32) + out tile (2x f32) + ~4 live (TM,C)
    # f32-equivalent temporaries (ctr / xn / h / xx).
    per_row = 8 * C * 4

    # Hold all weights resident if (conservatively double-buffered) they leave
    # most of the budget for activations.
    resident_w = 2 * w_all + p_all <= (2 * budget) // 5
    w_buffers = 3
    if resident_w:
        fixed = 2 * w_all + p_all
    else:
        fixed = w_buffers * C * C * 2 + 2 * 3 * C * 4
        if budget - fixed < 128 * per_row:            # not enough room -> 2 buffers
            w_buffers = 2
            fixed = w_buffers * C * C * 2 + 2 * 3 * C * 4

    avail = max(budget - fixed, 8 * per_row)
    tm_cap = max(8, min(avail // per_row, 2048))

    m8 = ((M + 7) // 8) * 8
    if m8 <= tm_cap:
        tm = m8
        m_pad = m8
    else:
        tm = (tm_cap // 128) * 128 if tm_cap >= 256 else (tm_cap // 8) * 8
        tm = max(tm, 8)
        m_pad = ((m8 + tm - 1) // tm) * tm

    footprint = fixed + per_row * tm + (4 << 20)
    vmem_limit = int(min((vmem_cap * 9) // 10, max(32 << 20, footprint)))
    return tm, m_pad, resident_w, w_buffers, vmem_limit


# --------------------------------------------------------------------------- #
# Wrapper
# --------------------------------------------------------------------------- #
def ont_block(x, weights, biases, gammas, betas, mask):
    """x: (..., C).  weights: (depth, C, C), biases/gammas/betas: (depth, C),
    mask: (C, C).  Returns same shape/dtype as x."""
    orig_shape = x.shape
    orig_dtype = x.dtype
    C = orig_shape[-1]
    depth = weights.shape[0]

    # Residual stream always accumulates in f32 (cast back at the end), so a
    # bf16 caller does not lose precision layer-over-layer.
    x2 = x.reshape(-1, C).astype(jnp.float32)
    M = x2.shape[0]

    # Fold ontology mask into the weights and pre-transpose once in XLA, then
    # hold/stream as bf16 (MXU-native, half the DMA / VMEM of f32 weights).
    w_mt = (weights * mask[None]).transpose(0, 2, 1).astype(jnp.bfloat16)
    # Pack bias / gamma / beta -> one (depth, 3, C) tensor (one tiny DMA/layer).
    params = jnp.stack([biases, gammas, betas], axis=1).astype(jnp.float32)

    vmem_cap = _vmem_capacity_bytes()
    TM, M_pad, resident_w, w_buffers, vmem_limit = _choose_tiling(M, C, depth, vmem_cap)
    if M_pad != M:
        x2 = jnp.pad(x2, ((0, M_pad - M), (0, 0)))

    grid = (M_pad // TM, depth)

    # TODO(synk): for production C < 128 the lane dim is under-dense (masked
    # stores, low MXU column utilization); folding independent rows into lanes
    # would change the LayerNorm reduction layout and is not implemented here.
    if resident_w:
        # Constant index_map -> weight stack DMA'd once, VMEM-resident for the
        # whole grid (no per-row-tile re-streaming; no per-core duplication
        # beyond one copy each).
        w_spec = pl.BlockSpec((depth, C, C), lambda i, d: (0, 0, 0))
    else:
        w_spec = pl.BlockSpec((pl.Squeezed(), C, C), lambda i, d: (d, 0, 0),
                              pipeline_mode=pl.Buffered(w_buffers))
    p_spec = pl.BlockSpec((pl.Squeezed(), 3, C), lambda i, d: (d, 0, 0))

    kind = _device_kind()
    bf16_act = ("v6" in kind) or ("v7" in kind)   # bf16 VPU/EUP parts only

    cost = pl.CostEstimate(
        flops=2 * M_pad * C * C * depth,
        transcendentals=M_pad * C * depth,
        bytes_accessed=2 * M_pad * C * 4 + w_mt.size * 2 + params.size * 4,
    )

    out = pl.pallas_call(
        _make_kernel(resident_w, bf16_act),
        out_shape=jax.ShapeDtypeStruct((M_pad, C), jnp.float32),
        grid_spec=pltpu.PrefetchScalarGridSpec(
            num_scalar_prefetch=0,
            grid=grid,
            in_specs=[
                pl.BlockSpec((TM, C), lambda i, d: (i, 0)),   # x row-tile
                w_spec,                                       # (W*mask)^T
                p_spec,                                       # bias/gamma/beta
            ],
            out_specs=pl.BlockSpec((TM, C), lambda i, d: (i, 0)),
        ),
        compiler_params=pltpu.CompilerParams(
            dimension_semantics=("parallel", "arbitrary"),
            vmem_limit_bytes=vmem_limit),
        cost_estimate=cost,
    )(x2, w_mt, params)

    if M_pad != M:
        out = out[:M]
    return out.reshape(orig_shape).astype(orig_dtype)


# --------------------------------------------------------------------------- #
# Pure-JAX reference (matches the PyTorch forward, eval mode, exact erf-GELU)
# --------------------------------------------------------------------------- #
def _reference(x, weights, biases, gammas, betas, mask):
    for d in range(weights.shape[0]):
        mean = jnp.mean(x, axis=-1, keepdims=True)
        var = jnp.mean((x - mean) ** 2, axis=-1, keepdims=True)
        xn = (x - mean) / jnp.sqrt(var + _LN_EPS)
        xn = xn * gammas[d] + betas[d]
        h = 0.5 * xn * (1.0 + jax.lax.erf(xn * _INV_SQRT2))
        wm = weights[d] * mask
        xx = h @ wm.T + biases[d]
        x = x + xx
    return x


if __name__ == "__main__":
    key = jax.random.PRNGKey(0)
    batch, seq, cio, depth = 2, 8, 32, 3

    kx, kw, kb, km = jax.random.split(key, 4)

    # Input
    x = jax.random.normal(kx, (batch, seq, cio), dtype=jnp.float32)

    # Deterministic parameter init (nn.Linear shapes: (cio, cio), (cio,))
    bound = 1.0 / math.sqrt(cio)
    weights = jax.random.uniform(kw, (depth, cio, cio), jnp.float32, -bound, bound)
    biases = jax.random.uniform(kb, (depth, cio), jnp.float32, -bound, bound)
    # nn.LayerNorm init: weight = 1, bias = 0
    gammas = jnp.ones((depth, cio), jnp.float32)
    betas = jnp.zeros((depth, cio), jnp.float32)
    # Ontology mask: deterministic binary matrix
    mask = (jax.random.uniform(km, (cio, cio)) > 0.5).astype(jnp.float32)

    out = ont_block(x, weights, biases, gammas, betas, mask)
    out = jax.block_until_ready(out)

    ref = _reference(x, weights, biases, gammas, betas, mask)
    assert out.shape == x.shape and out.dtype == x.dtype
    # Tolerance loosened vs the pure-f32 reference: the kernel runs the masked
    # linear on the MXU in bf16 (f32 accumulation), uses tanh-approx GELU, and
    # (on bf16-VPU parts) bf16 activation math — all intentional per perf review.
    assert jnp.allclose(out, ref, atol=2e-2, rtol=2e-2), "mismatch vs reference"

    print("KERNEL_OK")
</pallas_src>

<mosaic_0001>
module attributes {stable_mosaic.version = 11 : i64} {
  func.func @kernel(%arg0: i32, %arg1: i32, %arg2: memref<16x32xf32, #tpu.memory_space<vmem>>, %arg3: memref<3x32x32xbf16, #tpu.memory_space<vmem>>, %arg4: memref<1x3x32xf32, #tpu.memory_space<vmem>>, %arg5: memref<16x32xf32, #tpu.memory_space<vmem>>) attributes {dimension_semantics = [#tpu.dimension_semantics<parallel>, #tpu.dimension_semantics<arbitrary>], iteration_bounds = array<i64: 1, 3>, scalar_prefetch = 0 : i64, scratch_operands = 0 : i64, tpu.core_type = #tpu.core_type<tc>, window_params = [{transform_indices = @transform_0, window_bounds = array<i64: 16, 32>}, {pipeline_mode = #tpu.pipeline_mode<synchronous>, transform_indices = @transform_1, window_bounds = array<i64: 3, 32, 32>}, {transform_indices = @transform_2, window_bounds = array<i64: 1, 3, 32>}, {transform_indices = @transform_3, window_bounds = array<i64: 16, 32>}]} {
    %c0_i32 = arith.constant 0 : i32
    %0 = arith.cmpi eq, %arg1, %c0_i32 : i32
    %1 = arith.extui %0 : i1 to i32
    %c0_i32_0 = arith.constant 0 : i32
    %2 = arith.cmpi ne, %1, %c0_i32_0 : i32
    scf.if %2 {
      %c0_18 = arith.constant 0 : index
      %c0_19 = arith.constant 0 : index
      %51 = vector.load %arg2[%c0_18, %c0_19] : memref<16x32xf32, #tpu.memory_space<vmem>>, vector<16x32xf32>
      %c0_20 = arith.constant 0 : index
      %c0_21 = arith.constant 0 : index
      %52 = vector.load %arg5[%c0_20, %c0_21] : memref<16x32xf32, #tpu.memory_space<vmem>>, vector<16x32xf32>
      tpu.vector_store %arg5[%c0_20, %c0_21], %51 {strides = array<i32>} : memref<16x32xf32, #tpu.memory_space<vmem>>, vector<16x32xf32>,
    } else {
    }
    %c0 = arith.constant 0 : index
    %c0_1 = arith.constant 0 : index
    %3 = vector.load %arg5[%c0, %c0_1] : memref<16x32xf32, #tpu.memory_space<vmem>>, vector<16x32xf32>
    %4 = arith.index_cast %arg1 : i32 to index
    %c0_2 = arith.constant 0 : index
    %c0_3 = arith.constant 0 : index
    %5 = vector.load %arg3[%4, %c0_2, %c0_3] : memref<3x32x32xbf16, #tpu.memory_space<vmem>>, vector<1x32x32xbf16>
    %6 = vector.shape_cast %5 : vector<1x32x32xbf16> to vector<32x32xbf16>
    %c0_4 = arith.constant 0 : index
    %c0_5 = arith.constant 0 : index
    %c0_6 = arith.constant 0 : index
    %7 = vector.load %arg4[%c0_4, %c0_5, %c0_6] : memref<1x3x32xf32, #tpu.memory_space<vmem>>, vector<1x3x32xf32>
    %8 = vector.shape_cast %7 : vector<1x3x32xf32> to vector<3x32xf32>
    %9 = vector.extract_strided_slice %8 {offsets = [0, 0], sizes = [1, 32], strides = [1, 1]} : vector<3x32xf32> to vector<1x32xf32>
    %10 = vector.extract_strided_slice %8 {offsets = [1, 0], sizes = [1, 32], strides = [1, 1]} : vector<3x32xf32> to vector<1x32xf32>
    %11 = vector.extract_strided_slice %8 {offsets = [2, 0], sizes = [1, 32], strides = [1, 1]} : vector<3x32xf32> to vector<1x32xf32>
    %cst = arith.constant dense<0.000000e+00> : vector<16xf32>
    %12 = vector.multi_reduction <add>, %3, %cst [1] : vector<16x32xf32> to vector<16xf32>
    %13 = vector.shape_cast %12 : vector<16xf32> to vector<16x1xf32>
    %cst_7 = arith.constant 3.200000e+01 : f32
    %14 = vector.broadcast %cst_7 : f32 to vector<16x1xf32>
    %15 = arith.divf %13, %14 : vector<16x1xf32>
    %16 = vector.broadcast %15 : vector<16x1xf32> to vector<16x32xf32>
    %17 = arith.subf %3, %16 : vector<16x32xf32>
    %18 = arith.mulf %17, %17 : vector<16x32xf32>
    %cst_8 = arith.constant dense<0.000000e+00> : vector<16xf32>
    %19 = vector.multi_reduction <add>, %18, %cst_8 [1] : vector<16x32xf32> to vector<16xf32>
    %20 = vector.shape_cast %19 : vector<16xf32> to vector<16x1xf32>
    %cst_9 = arith.constant 3.200000e+01 : f32
    %21 = vector.broadcast %cst_9 : f32 to vector<16x1xf32>
    %22 = arith.divf %20, %21 : vector<16x1xf32>
    %cst_10 = arith.constant 9.99999974E-6 : f32
    %23 = vector.broadcast %cst_10 : f32 to vector<16x1xf32>
    %24 = arith.addf %22, %23 : vector<16x1xf32>
    %25 = math.rsqrt %24 : vector<16x1xf32>
    %26 = vector.broadcast %25 : vector<16x1xf32> to vector<16x32xf32>
    %27 = arith.mulf %17, %26 : vector<16x32xf32>
    %28 = vector.broadcast %10 : vector<1x32xf32> to vector<16x32xf32>
    %29 = arith.mulf %27, %28 : vector<16x32xf32>
    %30 = vector.broadcast %11 : vector<1x32xf32> to vector<16x32xf32>
    %31 = arith.addf %29, %30 : vector<16x32xf32>
    %cst_11 = arith.constant 5.000000e-01 : f32
    %32 = vector.broadcast %cst_11 : f32 to vector<16x32xf32>
    %33 = arith.mulf %32, %31 : vector<16x32xf32>
    %cst_12 = arith.constant 4.471500e-02 : f32
    %34 = vector.broadcast %cst_12 : f32 to vector<16x32xf32>
    %35 = arith.mulf %34, %31 : vector<16x32xf32>
    %36 = arith.mulf %35, %31 : vector<16x32xf32>
    %37 = arith.mulf %36, %31 : vector<16x32xf32>
    %38 = arith.addf %31, %37 : vector<16x32xf32>
    %cst_13 = arith.constant 0.797884583 : f32
    %39 = vector.broadcast %cst_13 : f32 to vector<16x32xf32>
    %40 = arith.mulf %39, %38 : vector<16x32xf32>
    %41 = math.tanh %40 : vector<16x32xf32>
    %cst_14 = arith.constant 1.000000e+00 : f32
    %42 = vector.broadcast %cst_14 : f32 to vector<16x32xf32>
    %43 = arith.addf %42, %41 : vector<16x32xf32>
    %44 = arith.mulf %33, %43 : vector<16x32xf32>
    %45 = arith.truncf %44 : vector<16x32xf32> to vector<16x32xbf16>
    %cst_15 = arith.constant dense<0.000000e+00> : vector<16x32xf32>
    %46 = tpu.matmul %45, %6, %cst_15 {dimension_numbers = #tpu.dot_dimension_numbers<[1], [0], [0], [1], [0, 0, 1, 1], [], []>} : vector<16x32xbf16>, vector<32x32xbf16>, vector<16x32xf32> -> vector<16x32xf32>
    %47 = vector.broadcast %9 : vector<1x32xf32> to vector<16x32xf32>
    %48 = arith.addf %46, %47 : vector<16x32xf32>
    %49 = arith.addf %3, %48 : vector<16x32xf32>
    %c0_16 = arith.constant 0 : index
    %c0_17 = arith.constant 0 : index
    %50 = vector.load %arg5[%c0_16, %c0_17] : memref<16x32xf32, #tpu.memory_space<vmem>>, vector<16x32xf32>
    tpu.vector_store %arg5[%c0_16, %c0_17], %49 {strides = array<i32>} : memref<16x32xf32, #tpu.memory_space<vmem>>, vector<16x32xf32>,
    return
  }
  func.func @transform_0(%arg0: i32, %arg1: i32) -> (i32, i32) {
    %c0_i32 = arith.constant 0 : i32
    %c0_i32_0 = arith.constant 0 : i32
    return %arg0, %c0_i32 : i32, i32
  }
  func.func @transform_1(%arg0: i32, %arg1: i32) -> (i32, i32, i32) {
    %c0_i32 = arith.constant 0 : i32
    %c0_i32_0 = arith.constant 0 : i32
    %c0_i32_1 = arith.constant 0 : i32
    %c0_i32_2 = arith.constant 0 : i32
    return %c0_i32, %c0_i32_0, %c0_i32_1 : i32, i32, i32
  }
  func.func @transform_2(%arg0: i32, %arg1: i32) -> (i32, i32, i32) {
    %c0_i32 = arith.constant 0 : i32
    %c0_i32_0 = arith.constant 0 : i32
    %c0_i32_1 = arith.constant 0 : i32
    return %arg1, %c0_i32, %c0_i32_0 : i32, i32, i32
  }
  func.func @transform_3(%arg0: i32, %arg1: i32) -> (i32, i32) {
    %c0_i32 = arith.constant 0 : i32
    %c0_i32_0 = arith.constant 0 : i32
    return %arg0, %c0_i32 : i32, i32
  }
}

</mosaic_0001>

<bundles_post_ra>
// kernel: tpu_custom_call.1
= control target key start
LH: loop header
LB: loop body
LE: loop exit
PB: predicated region body
PF: predicated region fallthrough
CT: control target
= control target key end

     0   :  { %8 = vsyncpa [#allocation3], 0  ;;  %s1046_s0 = inlined_call_operand.hbm [shape: f32[16,32], index: 0, kind: input, shape index: {}]   ;;  %s1047_s1 = inlined_call_operand.hbm [shape: bf16[3,32,32], index: 1, kind: input, shape index: {}]   ;;  %s1048_s2 = inlined_call_operand.hbm [shape: f32[3,3,32], index: 2, kind: input, shape index: {}]   ;;  %s1049_s3 = inlined_call_operand.hbm [shape: f32[16,32], index: 3, kind: output, shape index: {}]  }
   0x1   :  { %9 = vsyncpa [#allocation6], 0 }
   0x2   :  { %10 = vsyncpa [#allocation4], 0  ;;  %s809_s12 = smov 0   ;;  %s811_s13 = smov 0  }
   0x3   :  { %s813_s14 = smov 0   ;;  %s815_s15 = smov 0  }
   0x4   :  { %s817_s16 = smov 0   ;;  %s819_s17 = smov 0  }
   0x5 LB: > { %s838_s18 = sadd.s32 4294967295, %s775_s17   ;;  %p95_p0 = scmp.ne.s32.totalorder %s759_s13, %s755_s12  ;;  %s775_s17 = sphi %s819_s17, %s16_s17   ;;  %s771_s16 = sphi %s817_s16, %s1068_s16   ;;  %s767_s15 = sphi %s815_s15, %s1067_s15   ;;  %s763_s14 = sphi %s813_s14, %s1066_s14   ;;  %s759_s13 = sphi %s811_s13, %s1065_s13   ;;  %s755_s12 = sphi %s809_s12, %s1064_s12  }
   0x6   : > { %p1050_p1 = scmp.eq.s32.totalorder %s838_s18, 0  ;;  %p468_p2 = scmp.ge.s32.totalorder %s775_s17, 1 }
   0x7   : > { %p132_p3 = scmp.lt.s32.totalorder %s775_s17, 4  ;;  %s777_s21 = smov [#allocation2]  }
   0x8   : > { %p846_p4 = por %p1050_p1, %p95_p0  ;;  %s147_s22 = sshll.u32 %s777_s21, 4  ;;  %s148_s22 = int_to_ptr.vmem [resolvable:$true] %s147_s22 }
   0x9   : > { %p850_p5 = pnand %p468_p2, %p132_p3  ;;  %s778_s24 = smov [#allocation5]  }
   0xa   : > { %s1053_s19 = scalar_select %p846_p4, 1, 0 }
   0xb   : > { %s1054_s20 = scalar_select %p850_p5, 1, 0 }
   0xc   : > { %p514_p6 = pneg %p850_p5  ;;  %s160_s25 = sshll.u32 %s778_s24, 4  ;;  %s862_s25 = int_to_ptr.vmem [resolvable:$true] %s160_s25 }
   0xd   : > { %s601_s28 = scalar_lea.hbm %s1046_s0, 256 }
   0xe   : > { %p858_p7 = pnand %p514_p6, %p1050_p1  ;;  %p602_p8 = scmp.ne.s32.totalorder %s1046_s0, %s601_s28 }
   0xf   : > { %p608_p12 = scmp.lt.u32.totalorder %s601_s28, %s1046_s0 }
  0x10   : > { %p603_p9 = pneg %p858_p7 }
  0x12   : > { %p604_p10 = pnand %p603_p9, %p602_p8 }
  0x14   : > { %p605_p11 = pneg %p604_p10 }
  0x16   : > { %p610_p13 = pnand %p608_p12, %p605_p11 }
  0x18   : > { %613 = shalt.err (!%p610_p13)
}
  0x19   : > { %s614_s6 = scalar_lea.vmem %s148_s22, 256  ;;  %p622_p6 = scmp.lt.s32.totalorder %s148_s22, %s148_s22 }
  0x1a   : > { %p615_p0 = scmp.ne.s32.totalorder %s148_s22, %s614_s6  ;;  %p623_p1 = scmp.lt.s32.totalorder %s614_s6, %s614_s6 }
  0x1c   : > { %p617_p2 = pnand %p615_p0, %p603_p9  ;;  %p624_p4 = por %p623_p1, %p622_p6 }
  0x1e   : > { %p618_p3 = pneg %p617_p2 }
  0x20   : > { %p625_p5 = pnand %p624_p4, %p618_p3 }
  0x22   : > { %628 = shalt.err (!%p625_p5)
}
  0x23   : > { %s779_s7 = smov 128   ;;  %s780_s8 = smov 8  }
  0x24   : > { %517 = dma.hbm_to_vmem [thread:$0]  (!%p858_p7), %s1046_s0, 256, %s148_s22, [#allocation3], %s779_s7, %s779_s7, %s780_s8  }
  0x25   : > { %s629_s21 = scalar_lea.hbm %s1047_s1, 768 }
  0x26   : > { %p630_p8 = scmp.ne.s32.totalorder %s1047_s1, %s629_s21  ;;  %p636_p5 = scmp.lt.u32.totalorder %s629_s21, %s1047_s1 }
  0x28   : > { %p632_p1 = pnand %p630_p8, %p603_p9 }
  0x2a   : > { %p633_p4 = pneg %p632_p1 }
  0x2c   : > { %p638_p10 = pnand %p636_p5, %p633_p4 }
  0x2e   : > { %641 = shalt.err (!%p638_p10)
}
  0x2f   : > { %s642_s22 = scalar_lea.vmem %s862_s25, 768  ;;  %p650_p0 = scmp.lt.s32.totalorder %s862_s25, %s862_s25 }
  0x30   : > { %p643_p11 = scmp.ne.s32.totalorder %s862_s25, %s642_s22  ;;  %p651_p2 = scmp.lt.s32.totalorder %s642_s22, %s642_s22 }
  0x32   : > { %p645_p12 = pnand %p643_p11, %p603_p9  ;;  %p652_p3 = por %p651_p2, %p650_p0 }
  0x34   : > { %p646_p13 = pneg %p645_p12 }
  0x36   : > { %p653_p6 = pnand %p652_p3, %p646_p13 }
  0x38   : > { %656 = shalt.err (!%p653_p6)
}
  0x39   : > { %s781_s29 = smov 64   ;;  %s782_s30 = smov 4  }
  0x3a   : > { %520 = dma.hbm_to_vmem [thread:$0]  (!%p858_p7), %s1047_s1, 768, %s862_s25, [#allocation6], %s781_s29, %s781_s29, %s782_s30  }
  0x3b   : > { %s25_s6 = sadd.s32 1, %s771_s16  ;;  %s82_s7 = sadd.s32 1, %s763_s14 }
  0x3c   : > { %p26_p9 = scmp.ge.s32.totalorder %s25_s6, 3  ;;  %p89_p8 = scmp.ne.s32.totalorder %s763_s14, %s759_s13 }
  0x3d   : > { %p90_p1 = scmp.eq.s32.totalorder %s775_s17, 0  ;;  %p527_p4 = scmp.lt.s32.totalorder %s775_s17, 3 }
  0x3e   : > { %s1070_s6 = smov (%p26_p9, %s25_s6), 0  ;;  %s174_s8 = sand.u32 1, %s775_s17  }
  0x3f   : > { %p91_p5 = por %p90_p1, %p89_p8  ;;  %s79_s9 = ssub.s32 %s771_s16, %s1070_s6 }
  0x40   : > { %p80_p10 = scmp.eq.s32.totalorder %s79_s9, 0  ;;  %s176_s23 = sand.u32 1, %s763_s14  }
  0x41   : > { %s472_s10 = sshll.u32 %s176_s23, 2  ;;  %s473_s11 = sshll.u32 %s771_s16, 6 }
  0x42   : > { %s925_s12 = scalar_select %p80_p10, %s763_s14, %s82_s7  }
  0x43   : > { %s930_s24 = scalar_lea.hbm %s1048_s2, %s473_s11  ;;  %s178_s26 = scalar_lea.vmem [#allocation7], %s472_s10 }
  0x44   : > { %s185_s27 = sshll.u32 %s178_s26, 4  ;;  %p934_p7 = pnand %p527_p4, %p91_p5  ;;  %s938_s27 = int_to_ptr.vmem [resolvable:$true] %s185_s27 }
  0x45   : > { %s175_s22 = scalar_lea.sflag [#allocation3], %s174_s8  ;;  %s657_s29 = scalar_lea.hbm %s930_s24, 64 }
  0x46   : > { %p658_p11 = scmp.ne.s32.totalorder %s930_s24, %s657_s29  ;;  %p659_p12 = pneg %p934_p7 }
  0x47   : > { %s662_s5 = scalar_lea.hbm %s1048_s2, 192  ;;  %p663_p2 = scmp.lt.u32.totalorder %s930_s24, %s1048_s2 }
  0x48   : > { %p660_p13 = pnand %p659_p12, %p658_p11  ;;  %p664_p3 = scmp.lt.u32.totalorder %s662_s5, %s657_s29 }
  0x49   : > { %p666_p9 = scmp.lt.u32.totalorder %s657_s29, %s930_s24 }
  0x4a   : > { %p661_p0 = pneg %p660_p13  ;;  %p665_p6 = por %p664_p3, %p663_p2 }
  0x4c   : > { %p667_p8 = por %p666_p9, %p665_p6 }
  0x4e   : > { %p668_p1 = pnand %p667_p8, %p661_p0 }
  0x50   : > { %671 = shalt.err (!%p668_p1)
}
  0x51   : > { %s672_s8 = scalar_lea.vmem %s938_s27, 64  ;;  %s783_s23 = smov [#allocation7]  }
  0x52   : > { %p673_p4 = scmp.ne.s32.totalorder %s938_s27, %s672_s8  ;;  %s677_s10 = sshll.u32 %s783_s23, 4  ;;  %s678_s10 = int_to_ptr.vmem [resolvable:$false] %s677_s10 }
  0x53   : > { %s679_s11 = scalar_lea.vmem %s678_s10, 128  ;;  %p680_p11 = scmp.lt.s32.totalorder %s938_s27, %s678_s10 }
  0x54   : > { %p675_p5 = pnand %p673_p4, %p659_p12  ;;  %p681_p13 = scmp.lt.s32.totalorder %s679_s11, %s672_s8 }
  0x56   : > { %p676_p10 = pneg %p675_p5  ;;  %p682_p2 = por %p681_p13, %p680_p11 }
  0x58   : > { %p683_p3 = pnand %p682_p2, %p676_p10 }
  0x5a   : > { %686 = shalt.err (!%p683_p3)
}
  0x5b   : > { %524 = dma.hbm_to_vmem [thread:$0]  (!%p934_p7), %s930_s24, 64, %s938_s27, %s175_s22  }
  0x5c   : > { %p1057_p0 = scmp.ne.s32.totalorder %s1054_s20, 0 }
  0x5d   : > { %p1058_p12 = scmp.eq.s32.totalorder (!%p1057_p0), %s838_s18, 0 }
  0x5e   : > { %194 = sbr.rel (%p1057_p0) target bundleno = 699 (0x2bb), region = 32 }
  0x65   : > { %738 = dma.done.wait (%p1058_p12), [#allocation3], 256   ;;  %p1059_p6 = pmov %p1058_p12 }
  0x67   : > { %740 = vsyncadd (%p1059_p6), [#allocation3], 4294967040  ;;  %p1060_p9 = pmov %p1059_p6 }
  0x68   : > { %p1061_p8 = pmov %p1059_p6 }
  0x69   : > { %742 = dma.done.wait (%p1060_p9), [#allocation6], 768  }
  0x6a   : > { %744 = vsyncadd (%p1061_p8), [#allocation6], 4294966528  ;;  %s204_s25 = sand.u32 1, %s838_s18   ;;  %s206_s21 = sand.u32 1, %s759_s13  }
  0x6b   : > { %s977_s24 = sshll.u32 %s206_s21, 2  ;;  %s205_s20 = scalar_lea.sflag [#allocation3], %s204_s25 }
  0x6c   : > { %s208_s26 = scalar_lea.vmem [#allocation7], %s977_s24  ;;  %p1062_p7 = scmp.ne.s32.totalorder %s1053_s19, 0 }
  0x6e   : > { %746 = dma.done.wait (%p1062_p7), %s205_s20, 64  }
  0x6f   : > { %748 = vsyncadd (%p1062_p7), %s205_s20, 4294967232  ;;  %p478_p1 = scmp.ne.s32.totalorder %s767_s15, 0 }
  0x70   : > { %v233_v0 = vld [vmem:[#allocation2] sm:$0xff] (!%p478_p1)  ;;  %vm235_vm0 = vcmask (!%p478_p1), 261120   ;;  %v234_v1 = vld [vmem:[#allocation2 + $0x8] sm:$0xff] (!%p478_p1) }
  0x71   : > { %232 = sbr.rel (%p478_p1) target bundleno = 120 (0x78), region = 48  ;;  %236 = vst.msk [vmem:[#allocation8] sm:$0xff] (!%p478_p1), %vm235_vm0, %v233_v0  ;;  %237 = vst.msk [vmem:[#allocation8 + $0x8] sm:$0xff] (!%p478_p1), %vm235_vm0, %v234_v1 }
  0x78 PF: > { %v985_v2 = vld [vmem:[#allocation8] sm:$0xff]  ;;  %vm248_vm1 = vcmask 261120   ;;  %v987_v3 = vld [vmem:[#allocation8 + $0x8] sm:$0xff]  ;;  %s488_s19 = sshll.u32 %s767_s15, 4  ;;  %v784_v16 = vmov 0.0   ;;  %vm785_vm2 = vmmov 0   ;;  %v276_v21 = vlaneseq }
  0x79   : > { %v249_v4 = vsel %vm248_vm1, %v985_v2, 0.0  ;;  %v252_v5 = vsel %vm248_vm1, %v987_v3, 0.0  ;;  %492 = vmatprep.subr.bf16.mxu0 %v784_v16  ;;  %496 = vmatprep.mubr.msk.bf16.mxu0 %vm785_vm2, %v784_v16  ;;  %s242_s27 = scalar_lea.vmem [#allocation5], %s488_s19  ;;  %v247_v28 = vld [vmem:[%s208_s26] sm:$0x7]  ;;  %s786_s15 = smov [#allocation8]  }
  0x7a   : > { %250 = vadd.xlane.f32.xlu0 %v249_v4  ;;  %v591_v17 = vld [vmem:[%s242_s27] sm:$0xff]   ;;  %v592_v18 = vld [vmem:[%s242_s27 + $0x8] sm:$0xff]   ;;  %v277_v25 = vshrl.u32 %v276_v21, 7  ;;  %s380_s28 = sshll.u32 %s786_s15, 4  ;;  %p530_p4 = scmp.eq.s32.totalorder %s838_s18, 2  ;;  %s381_s28 = int_to_ptr.vmem [resolvable:$true] %s380_s28 }
  0x7b   : > { %493 = vmatpush3.bf16.msra.mxu0 %v591_v17  ;;  %s687_s22 = scalar_lea.vmem %s381_s28, 256  ;;  %p694_p13 = scmp.lt.s32.totalorder %s381_s28, %s381_s28 }
  0x7c   : > { %494 = vmatprep.subr.bf16.mxu0 %v784_v16  ;;  %v278_v27 = vsub.s32 1, %v277_v25  ;;  %v284_v29 = vsub.s32 2, %v277_v25  ;;  %v309_v59 = vsub.s32 0, %v277_v25  ;;  %p688_p5 = scmp.ne.s32.totalorder %s381_s28, %s687_s22  ;;  %p695_p2 = scmp.lt.s32.totalorder %s687_s22, %s687_s22 }
  0x7e   : > { %253 = vadd.xlane.f32.xlu0 %v252_v5  ;;  %v279_v30 = vrot.slane %v247_v28, %v278_v27  ;;  %v285_v32 = vrot.slane %v247_v28, %v284_v29  ;;  %v310_v60 = vrot.slane %v247_v28, %v309_v59  ;;  %p689_p10 = pnand %p688_p5, %p530_p4  ;;  %p696_p3 = por %p695_p2, %p694_p13 }
  0x7f   : > { %495 = vmatpush3.bf16.msra.mxu0 %v592_v18 }
  0x80   : > { %p690_p11 = pneg %p689_p10 }
  0x82   : > { %p697_p0 = pnand %p696_p3, %p690_p11 }
 0x107   : > { %v251_v6 = vpop.xlane.xlu0 %250 }
 0x108   : > { %v256_v7 = vmul.f32 0.03125, %v251_v6 }
 0x10a   : > { %v258_v8 = vsub.f32 %v985_v2, %v256_v7 }
 0x10b   : > { %v254_v9 = vpop.xlane.xlu0 %253 }
 0x10c   : > { %v257_v10 = vmul.f32 0.03125, %v254_v9  ;;  %v260_v11 = vmul.f32 %v258_v8, %v258_v8 }
 0x10e   : > { %v259_v12 = vsub.f32 %v987_v3, %v257_v10  ;;  %v262_v13 = vsel %vm248_vm1, %v260_v11, 0.0 }
 0x10f   : > { %263 = vadd.xlane.f32.xlu1 %v262_v13 }
 0x110   : > { %v261_v14 = vmul.f32 %v259_v12, %v259_v12 }
 0x112   : > { %v265_v15 = vsel %vm248_vm1, %v261_v14, 0.0 }
 0x113   : > { %266 = vadd.xlane.f32.xlu1 %v265_v15 }
 0x19c   : > { %v264_v19 = vpop.xlane.xlu1 %263 }
 0x19d   : > { %v268_v20 = vmul.f32 0.03125, %v264_v19 }
 0x19f   : > { %v270_v22 = vadd.f32 1e-05, %v268_v20 }
 0x1a0   : > { %v267_v23 = vpop.xlane.xlu1 %266 }
 0x1a1   : > { %593 = vrsqrt.f32 %v270_v22  ;;  %v269_v24 = vmul.f32 0.03125, %v267_v23 }
 0x1a3   : > { %v271_v26 = vadd.f32 1e-05, %v269_v24 }
 0x1a5   : > { %595 = vrsqrt.f32 %v271_v26 }
 0x1ab   : > { %v594_v31 = vpop.eup %593 }
 0x1ac   : > { %v274_v33 = vmul.f32 %v594_v31, %v258_v8 }
 0x1ae   : > { %v280_v34 = vmul.f32 %v279_v30, %v274_v33 }
 0x1af   : > { %v596_v35 = vpop.eup %595 }
 0x1b0   : > { %v286_v36 = vadd.f32 %v285_v32, %v280_v34  ;;  %v275_v37 = vmul.f32 %v596_v35, %v259_v12 }
 0x1b2   : > { %v281_v38 = vmul.f32 %v279_v30, %v275_v37  ;;  %v290_v39 = vmul.f32 0.044715, %v286_v36  ;;  %v288_v53 = vmul.f32 0.5, %v286_v36 }
 0x1b4   : > { %v287_v40 = vadd.f32 %v285_v32, %v281_v38  ;;  %v292_v41 = vmul.f32 %v290_v39, %v286_v36 }
 0x1b6   : > { %v291_v42 = vmul.f32 0.044715, %v287_v40  ;;  %v294_v43 = vmul.f32 %v292_v41, %v286_v36  ;;  %v289_v54 = vmul.f32 0.5, %v287_v40 }
 0x1b8   : > { %v293_v44 = vmul.f32 %v291_v42, %v287_v40  ;;  %v296_v45 = vadd.f32 %v294_v43, %v286_v36 }
 0x1ba   : > { %v295_v46 = vmul.f32 %v293_v44, %v287_v40  ;;  %v298_v47 = vmul.f32 0.7978846, %v296_v45 }
 0x1bc   : > { %v297_v48 = vadd.f32 %v295_v46, %v287_v40  ;;  %597 = vtanh.f32 %v298_v47 }
 0x1be   : > { %v299_v49 = vmul.f32 0.7978846, %v297_v48 }
 0x1c0   : > { %599 = vtanh.f32 %v299_v49 }
 0x1c6   : > { %v598_v50 = vpop.eup %597 }
 0x1c7   : > { %v302_v51 = vadd.f32 1.0, %v598_v50 }
 0x1c9   : > { %v304_v56 = vmul.f32 %v302_v51, %v288_v53 }
 0x1ca   : > { %v600_v52 = vpop.eup %599 }
 0x1cb   : > { %v303_v55 = vadd.f32 1.0, %v600_v52 }
 0x1cd   : > { %v305_v57 = vmul.f32 %v303_v55, %v289_v54 }
 0x1cf   : > { %v306_v58 = vpack.c.bf16 %v305_v57, %v304_v56 }
 0x1d1   : > { %497 = vmatmul.mubr.msk.bf16.vlgmr.msra.gmra.mrb[0].mxu0 %vm248_vm1, %v306_v58 }
 0x2a4   : > { %v360_v61 = vpop.f32.mrb[0].mxu0 }
 0x2a5   : > { %v361_v62 = vadd.f32 %v360_v61, %v310_v60  ;;  %v498_v63 = vpop.f32.mrb[1].mxu0 }
 0x2a6   : > { %v363_v0 = vpop.f32.mrb[2].mxu0 }
 0x2a7   : > { %v367_v1 = vadd.f32 %v361_v62, %v985_v2  ;;  %v364_v4 = vadd.f32 %v363_v0, %v310_v60  ;;  %v499_v5 = vpop.f32.mrb[3].mxu0 }
 0x2a9   : > { %369 = vst.msk [vmem:[#allocation8] sm:$0xff] %vm248_vm1, %v367_v1  ;;  %v368_v6 = vadd.f32 %v364_v4, %v987_v3 }
 0x2ab   : > { %370 = vst.msk [vmem:[#allocation8 + $0x8] sm:$0xff] %vm248_vm1, %v368_v6 }
 0x2ac   : > { %700 = shalt.err (!%p697_p0)
}
 0x2ad   : > { %s701_s4 = scalar_lea.hbm %s1049_s3, 256 }
 0x2ae   : > { %p702_p12 = scmp.ne.s32.totalorder %s1049_s3, %s701_s4  ;;  %p707_p8 = scmp.lt.u32.totalorder %s701_s4, %s1049_s3 }
 0x2b0   : > { %p703_p6 = pnand %p702_p12, %p530_p4 }
 0x2b2   : > { %p704_p9 = pneg %p703_p6 }
 0x2b4   : > { %p709_p7 = pnand %p707_p8, %p704_p9 }
 0x2b6   : > { %712 = shalt.err (!%p709_p7)
}
 0x2b7   : > { %s787_s23 = smov 128   ;;  %s788_s10 = smov 8  }
 0x2b8   : > { %511 = dma.vmem_to_hbm [thread:$0]  (%p530_p4), %s381_s28, 256, %s1049_s3, [#allocation4], %s787_s23, %s787_s23, %s788_s10  }
 0x2b9   : > { %750 = dma.done.wait (%p530_p4), [#allocation4], 256  }
 0x2ba   : > { %752 = vsyncadd (%p530_p4), [#allocation4], 4294967040 }
 0x2bb PF: > { %s16_s17 = sadd.s32 1, %s775_s17   ;;  %s1063_s21 = smov %s925_s12 }
 0x2bc   : > { %p13_p1 = scmp.ge.s32.totalorder %s16_s17, 5   ;;  %s1064_s12 = smov %s759_s13 }
 0x2bd   : > { %s1065_s13 = smov %s763_s14  ;;  %s1066_s14 = smov %s1063_s21 }
 0x2be   : > { %s1067_s15 = smov %s771_s16  ;;  %s1068_s16 = smov %s1070_s6 }
 0x2bf   :  { %15 = sbr.rel (!%p13_p1) target bundleno = 5 (0x5), region = 83 }
 0x2c6   :  { %396 = vsyncpa [#allocation3], 1 }
 0x2c7   :  { %398 = vsyncpa [#allocation3 + $0x1], 1 }
 0x2c8   :  { %399 = vsyncpa [#allocation6], 1 }
 0x2c9   :  { %400 = vsyncpa [#allocation4], 1 }
 0x2ca   :  { %402 = vsyncpa [#allocation4 + $0x1], 1 }

</bundles_post_ra>
